<compile_context>
chip_gen: v7x
topology: tpu7x:2x2x1
jax: 0.10.0
libtpu: 0.0.40
codegen_flags: <defaults>
</compile_context>

<pallas_src>
import functools

import jax
import jax.numpy as jnp
from jax.experimental import pallas as pl
from jax.experimental.pallas import tpu as pltpu


def _maxpool_kernel(x_ref, o_ref, *, K, S, H, W, Ho, Wo):
    """Separable KxK (stride S) max-pool of one NC tile.

    x_ref: (T, H, W)   input tile
    o_ref: (T, Ho, Wo) pooled output tile
    """
    x = x_ref[...]

    # ---- pool along H: elementwise maxima of row slices (VPU only) ----------
    rows = []
    for oh in range(Ho):
        h0 = oh * S
        kh = min(K, H - h0)                     # clamp: ceil_mode partial window
        r = x[:, h0:h0 + 1, :]
        for j in range(1, kh):
            r = jnp.maximum(r, x[:, h0 + j:h0 + j + 1, :])
        rows.append(r)
    h_red = jnp.concatenate(rows, axis=1) if len(rows) > 1 else rows[0]  # (T, Ho, W)

    # ---- pool along W --------------------------------------------------------
    cols = []
    for ow in range(Wo):
        w0 = ow * S
        kw = min(K, W - w0)                     # clamp: ceil_mode partial window
        c = h_red[:, :, w0:w0 + 1]
        for j in range(1, kw):
            c = jnp.maximum(c, h_red[:, :, w0 + j:w0 + j + 1])
        cols.append(c)
    out = jnp.concatenate(cols, axis=2) if len(cols) > 1 else cols[0]    # (T, Ho, Wo)

    o_ref[...] = out.astype(o_ref.dtype)


def _output_size(dim, K, S):
    """PyTorch MaxPool2d(ceil_mode=True, padding=0) output size along one dim."""
    n = (dim - K + S - 1) // S + 1              # ceil((dim - K) / S) + 1
    if (n - 1) * S >= dim:                      # last window must start inside input
        n -= 1
    return n


def _maxpool_pallas(x3, K, S, Ho, Wo):
    NC, H, W = x3.shape
    itemsize = jnp.dtype(x3.dtype).itemsize
    bytes_per_row = (H * W + Ho * Wo) * itemsize
    # ~8 MiB per (input+output) block; x2 double buffering keeps us well under
    # the scoped VMEM limit on v5e/v6e (128 MiB physical) and v7x (64 MiB).
    budget = 8 * 1024 * 1024
    tile_nc = max(1, min(NC, budget // max(bytes_per_row, 1)))

    kernel = functools.partial(_maxpool_kernel, K=K, S=S, H=H, W=W, Ho=Ho, Wo=Wo)
    return pl.pallas_call(
        kernel,
        out_shape=jax.ShapeDtypeStruct((NC, Ho, Wo), x3.dtype),
        grid=(pl.cdiv(NC, tile_nc),),
        # Full H/W per block (== array dims, so always layout-legal); tile only NC.
        in_specs=[pl.BlockSpec((tile_nc, H, W), lambda i: (i, 0, 0))],
        out_specs=pl.BlockSpec((tile_nc, Ho, Wo), lambda i: (i, 0, 0)),
        compiler_params=pltpu.CompilerParams(
            dimension_semantics=("parallel",)),
    )(x3)


def _maxpool_reference(x, K, S, Ho, Wo):
    """jax.lax.reduce_window fallback / reference (ceil_mode via right-pad)."""
    H, W = x.shape[-2], x.shape[-1]
    Hp = (Ho - 1) * S + K
    Wp = (Wo - 1) * S + K
    if jnp.issubdtype(x.dtype, jnp.floating):
        init = jnp.array(-jnp.inf, dtype=x.dtype)
    else:
        init = jnp.array(jnp.iinfo(x.dtype).min, dtype=x.dtype)
    return jax.lax.reduce_window(
        x, init, jax.lax.max,
        window_dimensions=(1, 1, K, K),
        window_strides=(1, 1, S, S),
        padding=((0, 0), (0, 0), (0, Hp - H), (0, Wp - W)))


def maxpool2d_ceil(x, kernel_size=3, stride=None, use_pallas=None):
    """Equivalent of torch.nn.MaxPool2d(kernel_size, ceil_mode=True) on NCHW input."""
    if stride is None:
        stride = kernel_size
    N, C, H, W = x.shape
    K, S = kernel_size, stride
    assert H >= K and W >= K, "MaxPool2d with padding=0 requires H, W >= kernel_size"

    Ho = _output_size(H, K, S)
    Wo = _output_size(W, K, S)

    if use_pallas is None:
        # pallas_call launch overhead dominates for tiny inputs; route to XLA.
        use_pallas = x.size >= (1 << 15)
    if not use_pallas:
        return _maxpool_reference(x, K, S, Ho, Wo)

    out = _maxpool_pallas(x.reshape(N * C, H, W), K, S, Ho, Wo)
    return out.reshape(N, C, Ho, Wo)


if __name__ == "__main__":
    key = jax.random.PRNGKey(0)
    k1, k2 = jax.random.split(key)

    # Shape the original module operates on: input reshaped to (1, 1, 5, 5).
    x_small = jax.random.normal(k1, (1, 1, 5, 5), dtype=jnp.float32)
    # Larger shape exercising NC tiling and ragged ceil_mode windows on both axes.
    x_large = jax.random.normal(k2, (2, 4, 17, 13), dtype=jnp.float32)

    for x in (x_small, x_large):
        out = jax.block_until_ready(maxpool2d_ceil(x, kernel_size=3, use_pallas=True))
        ref = jax.block_until_ready(maxpool2d_ceil(x, kernel_size=3, use_pallas=False))
        assert out.shape == ref.shape, (out.shape, ref.shape)
        assert jnp.allclose(out, ref), (x.shape, out, ref)

    # Module-level sanity: (1,1,5,5) -> (1,1,2,2) with ceil_mode=True.
    assert maxpool2d_ceil(x_small, kernel_size=3).shape == (1, 1, 2, 2)

    print("KERNEL_OK")
</pallas_src>

<mosaic_0001>
module attributes {stable_mosaic.version = 11 : i64} {
  func.func @_maxpool_kernel(%arg0: i32, %arg1: memref<1x5x5xf32, #tpu.memory_space<vmem>>, %arg2: memref<1x2x2xf32, #tpu.memory_space<vmem>>) attributes {dimension_semantics = [#tpu.dimension_semantics<parallel>], iteration_bounds = array<i64: 1>, scalar_prefetch = 0 : i64, scratch_operands = 0 : i64, tpu.core_type = #tpu.core_type<tc>, window_params = [{transform_indices = @transform_0, window_bounds = array<i64: 1, 5, 5>}, {transform_indices = @transform_1, window_bounds = array<i64: 1, 2, 2>}]} {
    %c0 = arith.constant 0 : index
    %c0_0 = arith.constant 0 : index
    %c0_1 = arith.constant 0 : index
    %0 = vector.load %arg1[%c0, %c0_0, %c0_1] : memref<1x5x5xf32, #tpu.memory_space<vmem>>, vector<1x5x5xf32>
    %1 = vector.extract_strided_slice %0 {offsets = [0, 0, 0], sizes = [1, 1, 5], strides = [1, 1, 1]} : vector<1x5x5xf32> to vector<1x1x5xf32>
    %2 = vector.extract_strided_slice %0 {offsets = [0, 1, 0], sizes = [1, 1, 5], strides = [1, 1, 1]} : vector<1x5x5xf32> to vector<1x1x5xf32>
    %3 = arith.maximumf %1, %2 : vector<1x1x5xf32>
    %4 = vector.extract_strided_slice %0 {offsets = [0, 2, 0], sizes = [1, 1, 5], strides = [1, 1, 1]} : vector<1x5x5xf32> to vector<1x1x5xf32>
    %5 = arith.maximumf %3, %4 : vector<1x1x5xf32>
    %6 = vector.extract_strided_slice %0 {offsets = [0, 3, 0], sizes = [1, 1, 5], strides = [1, 1, 1]} : vector<1x5x5xf32> to vector<1x1x5xf32>
    %7 = vector.extract_strided_slice %0 {offsets = [0, 4, 0], sizes = [1, 1, 5], strides = [1, 1, 1]} : vector<1x5x5xf32> to vector<1x1x5xf32>
    %8 = arith.maximumf %6, %7 : vector<1x1x5xf32>
    %9 = tpu.concatenate %5, %8 in 1 : vector<1x1x5xf32>, vector<1x1x5xf32> -> vector<1x2x5xf32>
    %10 = vector.extract_strided_slice %9 {offsets = [0, 0, 0], sizes = [1, 2, 1], strides = [1, 1, 1]} : vector<1x2x5xf32> to vector<1x2x1xf32>
    %11 = vector.extract_strided_slice %9 {offsets = [0, 0, 1], sizes = [1, 2, 1], strides = [1, 1, 1]} : vector<1x2x5xf32> to vector<1x2x1xf32>
    %12 = arith.maximumf %10, %11 : vector<1x2x1xf32>
    %13 = vector.extract_strided_slice %9 {offsets = [0, 0, 2], sizes = [1, 2, 1], strides = [1, 1, 1]} : vector<1x2x5xf32> to vector<1x2x1xf32>
    %14 = arith.maximumf %12, %13 : vector<1x2x1xf32>
    %15 = vector.extract_strided_slice %9 {offsets = [0, 0, 3], sizes = [1, 2, 1], strides = [1, 1, 1]} : vector<1x2x5xf32> to vector<1x2x1xf32>
    %16 = vector.extract_strided_slice %9 {offsets = [0, 0, 4], sizes = [1, 2, 1], strides = [1, 1, 1]} : vector<1x2x5xf32> to vector<1x2x1xf32>
    %17 = arith.maximumf %15, %16 : vector<1x2x1xf32>
    %18 = tpu.concatenate %14, %17 in 2 : vector<1x2x1xf32>, vector<1x2x1xf32> -> vector<1x2x2xf32>
    %c0_2 = arith.constant 0 : index
    %c0_3 = arith.constant 0 : index
    %c0_4 = arith.constant 0 : index
    %19 = vector.load %arg2[%c0_2, %c0_3, %c0_4] : memref<1x2x2xf32, #tpu.memory_space<vmem>>, vector<1x2x2xf32>
    tpu.vector_store %arg2[%c0_2, %c0_3, %c0_4], %18 {strides = array<i32>} : memref<1x2x2xf32, #tpu.memory_space<vmem>>, vector<1x2x2xf32>,
    return
  }
  func.func @transform_0(%arg0: i32) -> (i32, i32, i32) {
    %c0_i32 = arith.constant 0 : i32
    %c0_i32_0 = arith.constant 0 : i32
    %c0_i32_1 = arith.constant 0 : i32
    return %arg0, %c0_i32, %c0_i32_0 : i32, i32, i32
  }
  func.func @transform_1(%arg0: i32) -> (i32, i32, i32) {
    %c0_i32 = arith.constant 0 : i32
    %c0_i32_0 = arith.constant 0 : i32
    %c0_i32_1 = arith.constant 0 : i32
    return %arg0, %c0_i32, %c0_i32_0 : i32, i32, i32
  }
}

</mosaic_0001>

<bundles_post_ra>
// kernel: tpu_custom_call.1
= control target key start
LH: loop header
LB: loop body
LE: loop exit
PB: predicated region body
PF: predicated region fallthrough
CT: control target
= control target key end

     0   :  { %s108_s0 = inlined_call_operand.vmem [shape: f32[1,5,5], index: 0, kind: input, shape index: {}]   ;;  %s109_s1 = inlined_call_operand.hbm [shape: f32[1,2,2], index: 1, kind: output, shape index: {}]  }
   0x1   :  { %v9_v0 = vld [vmem:[%s108_s0] sm:$0x1f] }
   0x2   :  { %v11_v1 = vrot.slane %v9_v0, 1  ;;  %v14_v2 = vrot.slane %v9_v0, 2 }
   0x3   :  { %6 = vsyncpa [#allocation3], 0  ;;  %vm20_vm0 = vcmask 1040384   ;;  %s80_s8 = smov 127   ;;  %s81_s9 = smov 126   ;;  %vm35_vm1 = vcmask 7168  }
   0x4   :  { %v13_v3 = vmax.f32 %v9_v0, %v11_v1  ;;  %s82_s10 = smov [#allocation2]   ;;  %vm37_vm2 = vcmask 9216  }
   0x5   :  { %s45_s11 = sshll.u32 %s82_s10, 4  ;;  %s46_s11 = int_to_ptr.vmem [resolvable:$true] %s45_s11 }
   0x6   :  { %v16_v4 = vmax.f32 %v13_v3, %v14_v2  ;;  %v18_v5 = vrot.slane %v13_v3, 2  ;;  %s56_s0 = scalar_lea.vmem %s46_s11, 32  ;;  %p61_p1 = scmp.lt.s32.totalorder %s46_s11, %s46_s11 }
   0x7   :  { %p57_p0 = scmp.ne.s32.totalorder %s46_s11, %s56_s0  ;;  %p62_p2 = scmp.lt.s32.totalorder %s56_s0, %s56_s0 }
   0x8   :  { %v21_v6 = vsel %vm20_vm0, %v16_v4, %v18_v5 }
   0x9   :  { %23 = vrot.lane.b32.xlu0 %v21_v6, %s80_s8  ;;  %p63_p3 = por %p62_p2, %p61_p1 }
   0xb   :  { %p64_p4 = pnand %p63_p3, %p57_p0 }
   0xd   :  { %27 = vrot.lane.b32.xlu0 %v21_v6, %s81_s9 }
  0x7b   :  { %v24_v7 = vpop.permute.xlu0 %23 }
  0x7c   :  { %v26_v8 = vmax.f32 %v21_v6, %v24_v7 }
  0x7e   :  { %32 = vrot.lane.b32.xlu1 %v26_v8, %s81_s9 }
  0x7f   :  { %v28_v9 = vpop.permute.xlu0 %27 }
  0x80   :  { %v30_v10 = vmax.f32 %v26_v8, %v28_v9 }
  0xf0   :  { %v33_v11 = vpop.permute.xlu1 %32 }
  0xf1   :  { %v36_v12 = vsel %vm35_vm1, %v30_v10, %v33_v11 }
  0xf2   :  { %38 = vst.msk [vmem:[#allocation2] sm:$0x3] %vm37_vm2, %v36_v12 }
  0xf3   :  { %67 = shalt.err (!%p64_p4)
}
  0xf4   :  { %s68_s14 = scalar_lea.hbm %s109_s1, 32 }
  0xf5   :  { %p69_p5 = scmp.ne.s32.totalorder %s109_s1, %s68_s14  ;;  %p72_p6 = scmp.lt.u32.totalorder %s68_s14, %s109_s1 }
  0xf7   :  { %p74_p7 = pnand %p72_p6, %p69_p5 }
  0xf9   :  { %77 = shalt.err (!%p74_p7)
}
  0xfa   :  { %48 = dma.vmem_to_hbm [thread:$0]  %s46_s11, 32, %s109_s1, [#allocation3]  }
  0xfb   :  { %78 = dma.done.wait [#allocation3], 32  }
  0xfc   :  { %79 = vsyncadd [#allocation3], 4294967264 }
  0xfd   :  { %52 = vsyncpa [#allocation3], 1 }

</bundles_post_ra>
